<compile_context>
chip_gen: v5e
topology: v5e:2x2
jax: 0.10.0
libtpu: 0.0.40
codegen_flags: <defaults>
</compile_context>

<pallas_src>
import jax
import jax.numpy as jnp
from jax.experimental import pallas as pl
from jax.experimental.pallas import tpu as pltpu

EPS = 1e-5


def _round_up(n, m):
    return (n + m - 1) // m * m


def _vmem_limit_bytes():
    """Generation-aware VMEM budget (~75% of physical capacity)."""
    try:
        info = pltpu.get_tpu_info()
        cap = getattr(info, "vmem_capacity_bytes", None)
        if cap:
            return int(cap) * 3 // 4          # v5e/v6e -> ~96 MiB, v7x -> ~48 MiB
    except Exception:
        pass
    return 48 * 1024 * 1024                   # safe fallback (fits v7x's 64 MiB)


# --------------------------------------------------------------------------
# Fused single-call path (both weight matrices VMEM-resident).
# --------------------------------------------------------------------------
def _make_fused_kernel(n_valid: int, n_pad: int):
    need_mask = n_valid != n_pad

    def kernel(xb_ref, res_ref, w1_ref, w2_ref, gb1_ref, gb2_ref, o_ref):
        inv_n = jnp.float32(1.0 / n_valid)

        def bn(h, gb_ref):
            # One-pass stats: padded batch rows of `h` are exactly zero
            # (inputs zero-padded, biases dropped), so unmasked sums divided
            # by n_valid are exact.
            s1 = jnp.sum(h, axis=0, keepdims=True)
            s2 = jnp.sum(h * h, axis=0, keepdims=True)
            mean = s1 * inv_n
            var = jnp.maximum(s2 * inv_n - mean * mean, 0.0)
            a = gb_ref[0:1, :] * jax.lax.rsqrt(var + EPS)
            b = gb_ref[1:2, :] - mean * a
            return h * a + b

        # Stage 1: x @ W1^T (bf16 MXU, f32 acc), BN, ReLU.
        h1 = jax.lax.dot_general(
            xb_ref[...], w1_ref[...],
            dimension_numbers=(((1,), (1,)), ((), ())),
            preferred_element_type=jnp.float32)
        h1 = jnp.maximum(bn(h1, gb1_ref), 0.0)

        if need_mask:
            # BN shifts the zero-padded batch rows off zero; re-zero them so
            # stage-2 statistics stay exact with the same unmasked-sum trick.
            row = jax.lax.broadcasted_iota(jnp.int32, (n_pad, 1), 0)
            h1 = jnp.where(row < n_valid, h1, 0.0)

        # Stage 2: h1 @ W2^T, BN, + residual, ReLU.
        h2 = jax.lax.dot_general(
            h1.astype(jnp.bfloat16), w2_ref[...],
            dimension_numbers=(((1,), (1,)), ((), ())),
            preferred_element_type=jnp.float32)
        y = bn(h2, gb2_ref) + res_ref[...]
        o_ref[...] = jnp.maximum(y, 0.0).astype(o_ref.dtype)

    return kernel


def _fused_forward(xb, xp, prepped, n_valid, out_dtype, budget):
    n_pad, c_pad = xb.shape
    return pl.pallas_call(
        _make_fused_kernel(n_valid, n_pad),
        out_shape=jax.ShapeDtypeStruct((n_pad, c_pad), out_dtype),
        grid=(1,),
        in_specs=[
            pl.BlockSpec((n_pad, c_pad), lambda i: (0, 0)),   # x (bf16)
            pl.BlockSpec((n_pad, c_pad), lambda i: (0, 0)),   # residual (f32)
            pl.BlockSpec((c_pad, c_pad), lambda i: (0, 0)),   # W1 (bf16)
            pl.BlockSpec((c_pad, c_pad), lambda i: (0, 0)),   # W2 (bf16)
            pl.BlockSpec((8, c_pad), lambda i: (0, 0)),       # gamma/beta 1
            pl.BlockSpec((8, c_pad), lambda i: (0, 0)),       # gamma/beta 2
        ],
        out_specs=pl.BlockSpec((n_pad, c_pad), lambda i: (0, 0)),
        compiler_params=pltpu.CompilerParams(vmem_limit_bytes=budget),
    )(xb, xp, prepped["w1"], prepped["w2"], prepped["gb1"], prepped["gb2"])


# --------------------------------------------------------------------------
# Tiled two-stage path (large C): K-accumulating 2-D grid per stage.
# --------------------------------------------------------------------------
def _make_stage_kernel(add_residual: bool, n_valid: int):
    """fc -> bn(train) -> [+residual] -> relu for one output-feature tile."""

    def _body(x_ref, w_ref, gb_ref, res_ref, o_ref, acc_ref):
        k = pl.program_id(1)

        @pl.when(k == 0)
        def _():
            acc_ref[...] = jnp.zeros_like(acc_ref)

        # (N, tk) x (tn, tk) contracted on the in-feature axis of both
        # (== x @ W^T); LHS is already bf16, f32 accumulation on the MXU.
        acc_ref[...] += jax.lax.dot_general(
            x_ref[...], w_ref[...],
            dimension_numbers=(((1,), (1,)), ((), ())),
            preferred_element_type=jnp.float32)

        @pl.when(k == pl.num_programs(1) - 1)
        def _():
            h = acc_ref[...]
            n_pad = h.shape[0]
            inv_n = jnp.float32(1.0 / n_valid)
            if n_valid != n_pad:
                # Exclude zero-padded batch rows from the statistics
                # ((n_pad, 1) column mask; one-pass sums).
                row = jax.lax.broadcasted_iota(jnp.int32, (n_pad, 1), 0)
                mask = (row < n_valid).astype(jnp.float32)
                hm = h * mask
                s1 = jnp.sum(hm, axis=0, keepdims=True)
                s2 = jnp.sum(hm * h, axis=0, keepdims=True)
            else:
                s1 = jnp.sum(h, axis=0, keepdims=True)
                s2 = jnp.sum(h * h, axis=0, keepdims=True)
            mean = s1 * inv_n
            var = jnp.maximum(s2 * inv_n - mean * mean, 0.0)
            a = gb_ref[0:1, :] * jax.lax.rsqrt(var + EPS)
            b = gb_ref[1:2, :] - mean * a
            y = h * a + b
            if add_residual:
                y = y + res_ref[...]
            o_ref[...] = jnp.maximum(y, 0.0).astype(o_ref.dtype)

    if add_residual:
        def kernel(x_ref, w_ref, gb_ref, res_ref, o_ref, acc_ref):
            _body(x_ref, w_ref, gb_ref, res_ref, o_ref, acc_ref)
    else:
        def kernel(x_ref, w_ref, gb_ref, o_ref, acc_ref):
            _body(x_ref, w_ref, gb_ref, None, o_ref, acc_ref)
    return kernel


def _pick_tiles(n_pad, c_pad, budget):
    """Decouple tn (output tile: LHS re-read factor, store lane density) from
    tk (contraction tile: LHS block size).  Prefer large tn, moderate tk."""
    def fits(tn, tk):
        lhs = 2 * n_pad * tk * 2          # double-buffered bf16 LHS block
        w = 2 * tn * tk * 2               # double-buffered bf16 W tile
        gb = 2 * 8 * tn * 4
        res = 2 * n_pad * tn * 4          # worst case (stage 2 residual)
        out = 2 * n_pad * tn * 4
        acc = n_pad * tn * 4
        return lhs + w + gb + res + out + acc <= int(0.8 * budget)

    for tn in (512, 256, 128):
        if c_pad % tn != 0 or c_pad // tn < 2:   # >=2 j-tiles for v7x megacore
            continue
        for tk in (256, 128):
            if c_pad % tk != 0:
                continue
            if fits(tn, tk):
                return tn, tk
    return 128, 128


def _stage(x_in, w_bf16, gb, residual, *, n_valid, out_dtype, budget):
    n_pad, c_pad = x_in.shape
    tn, tk = _pick_tiles(n_pad, c_pad, budget)

    in_specs = [
        pl.BlockSpec((n_pad, tk), lambda j, k: (0, k)),   # bf16 LHS, batch resident
        pl.BlockSpec((tn, tk), lambda j, k: (j, k)),      # W (out, in) tile
        pl.BlockSpec((8, tn), lambda j, k: (0, j)),       # packed gamma/beta
    ]
    args = [x_in, w_bf16, gb]
    if residual is not None:
        in_specs.append(pl.BlockSpec((n_pad, tn), lambda j, k: (0, j)))
        args.append(residual)

    return pl.pallas_call(
        _make_stage_kernel(residual is not None, n_valid),
        out_shape=jax.ShapeDtypeStruct((n_pad, c_pad), out_dtype),
        grid_spec=pltpu.PrefetchScalarGridSpec(
            num_scalar_prefetch=0,
            grid=(c_pad // tn, c_pad // tk),
            in_specs=in_specs,
            out_specs=pl.BlockSpec((n_pad, tn), lambda j, k: (0, j)),
            scratch_shapes=[pltpu.VMEM((n_pad, tn), jnp.float32)],
        ),
        compiler_params=pltpu.CompilerParams(
            dimension_semantics=("parallel", "arbitrary"),
            vmem_limit_bytes=budget,
        ),
    )(*args)


# --------------------------------------------------------------------------
# Wrapper / parameter prep
# --------------------------------------------------------------------------
def prepare_resblock_params(params):
    """One-time prep (call ONCE, outside the jitted forward): pad weights to a
    128-multiple, cast to bf16, pack gamma/beta into sublane-aligned slabs.
    fc biases cancel exactly under training-mode BN and are dropped."""
    C = params["w1"].shape[0]
    c_pad = _round_up(max(C, 128), 128)
    pad2 = ((0, c_pad - C), (0, c_pad - C))

    def pack_gb(gamma, beta):
        gb = jnp.zeros((8, c_pad), jnp.float32)
        gb = gb.at[0, :C].set(gamma.astype(jnp.float32))
        gb = gb.at[1, :C].set(beta.astype(jnp.float32))
        return gb

    return {
        "w1": jnp.pad(params["w1"].astype(jnp.float32), pad2).astype(jnp.bfloat16),
        "w2": jnp.pad(params["w2"].astype(jnp.float32), pad2).astype(jnp.bfloat16),
        "gb1": pack_gb(params["gamma1"], params["beta1"]),
        "gb2": pack_gb(params["gamma2"], params["beta2"]),
    }


@jax.jit
def resblock_forward(x, prepped):
    """x: (N, C) float32.  prepped: output of prepare_resblock_params."""
    N, C = x.shape
    c_pad = prepped["w1"].shape[0]
    n_pad = _round_up(max(N, 8), 8)

    xp = jnp.pad(x.astype(jnp.float32), ((0, n_pad - N), (0, c_pad - C)))
    xb = xp.astype(jnp.bfloat16)          # bf16 LHS cast done once, here

    budget = _vmem_limit_bytes()
    # Rough fused-path footprint: both bf16 weights + a handful of
    # (n_pad, c_pad) f32 activation slabs / temporaries.
    fused_bytes = 2 * (2 * c_pad * c_pad) + 10 * n_pad * c_pad * 4
    if c_pad <= 2048 and fused_bytes <= int(0.7 * budget):
        out = _fused_forward(xb, xp, prepped, N, x.dtype, budget)
    else:
        h = _stage(xb, prepped["w1"], prepped["gb1"], None,
                   n_valid=N, out_dtype=jnp.bfloat16, budget=budget)
        out = _stage(h, prepped["w2"], prepped["gb2"], xp,
                     n_valid=N, out_dtype=x.dtype, budget=budget)
    return out[:N, :C]


def init_resblock_params(key, channels):
    """Deterministic synthetic init (matches nn.Linear/BatchNorm1d shapes)."""
    k1, k2, k3, k4 = jax.random.split(key, 4)
    bound = 1.0 / (channels ** 0.5)
    return {
        "w1": jax.random.uniform(k1, (channels, channels), jnp.float32, -bound, bound),
        "b1": jax.random.uniform(k2, (channels,), jnp.float32, -bound, bound),
        "w2": jax.random.uniform(k3, (channels, channels), jnp.float32, -bound, bound),
        "b2": jax.random.uniform(k4, (channels,), jnp.float32, -bound, bound),
        "gamma1": jnp.ones((channels,), jnp.float32),
        "beta1": jnp.zeros((channels,), jnp.float32),
        "gamma2": jnp.ones((channels,), jnp.float32),
        "beta2": jnp.zeros((channels,), jnp.float32),
    }


def _reference(x, p):
    """Pure-JAX f32 reference matching the PyTorch module in training mode."""
    h = x @ p["w1"].T + p["b1"]
    m = h.mean(0, keepdims=True); v = ((h - m) ** 2).mean(0, keepdims=True)
    h = (h - m) / jnp.sqrt(v + EPS) * p["gamma1"] + p["beta1"]
    h = jnp.maximum(h, 0.0)
    h2 = h @ p["w2"].T + p["b2"]
    m2 = h2.mean(0, keepdims=True); v2 = ((h2 - m2) ** 2).mean(0, keepdims=True)
    h2 = (h2 - m2) / jnp.sqrt(v2 + EPS) * p["gamma2"] + p["beta2"]
    return jnp.maximum(h2 + x, 0.0)


if __name__ == "__main__":
    key = jax.random.PRNGKey(0)
    kx, kp = jax.random.split(key)

    N, C = 13, 32   # non-multiple-of-8 batch exercises the padded-row masking
    x = jax.random.normal(kx, (N, C), jnp.float32)
    params = init_resblock_params(kp, C)
    prepped = prepare_resblock_params(params)   # one-time, hoisted out of forward

    out = jax.block_until_ready(resblock_forward(x, prepped))
    ref = _reference(x, params)

    assert out.shape == (N, C)
    assert out.dtype == x.dtype
    # bf16 MXU inputs loosen the tolerance vs the pure-f32 reference.
    max_diff = float(jnp.max(jnp.abs(out - ref)))
    assert jnp.allclose(out, ref, atol=5e-2, rtol=5e-2), (
        f"mismatch vs reference: max abs diff = {max_diff}")

    print("KERNEL_OK")
</pallas_src>

<mosaic_0001>
module attributes {stable_mosaic.version = 11 : i64} {
  func.func @kernel(%arg0: i32, %arg1: memref<16x128xbf16, #tpu.memory_space<vmem>>, %arg2: memref<16x128xf32, #tpu.memory_space<vmem>>, %arg3: memref<128x128xbf16, #tpu.memory_space<vmem>>, %arg4: memref<128x128xbf16, #tpu.memory_space<vmem>>, %arg5: memref<8x128xf32, #tpu.memory_space<vmem>>, %arg6: memref<8x128xf32, #tpu.memory_space<vmem>>, %arg7: memref<16x128xf32, #tpu.memory_space<vmem>>) attributes {dimension_semantics = [#tpu.dimension_semantics<arbitrary>], iteration_bounds = array<i64: 1>, scalar_prefetch = 0 : i64, scratch_operands = 0 : i64, tpu.core_type = #tpu.core_type<tc>, window_params = [{pipeline_mode = #tpu.pipeline_mode<synchronous>, transform_indices = @transform_0, window_bounds = array<i64: 16, 128>}, {pipeline_mode = #tpu.pipeline_mode<synchronous>, transform_indices = @transform_1, window_bounds = array<i64: 16, 128>}, {pipeline_mode = #tpu.pipeline_mode<synchronous>, transform_indices = @transform_2, window_bounds = array<i64: 128, 128>}, {pipeline_mode = #tpu.pipeline_mode<synchronous>, transform_indices = @transform_3, window_bounds = array<i64: 128, 128>}, {pipeline_mode = #tpu.pipeline_mode<synchronous>, transform_indices = @transform_4, window_bounds = array<i64: 8, 128>}, {pipeline_mode = #tpu.pipeline_mode<synchronous>, transform_indices = @transform_5, window_bounds = array<i64: 8, 128>}, {pipeline_mode = #tpu.pipeline_mode<synchronous>, transform_indices = @transform_6, window_bounds = array<i64: 16, 128>}]} {
    %c0 = arith.constant 0 : index
    %c0_0 = arith.constant 0 : index
    %0 = vector.load %arg1[%c0, %c0_0] : memref<16x128xbf16, #tpu.memory_space<vmem>>, vector<16x128xbf16>
    %c0_1 = arith.constant 0 : index
    %c0_2 = arith.constant 0 : index
    %1 = vector.load %arg3[%c0_1, %c0_2] : memref<128x128xbf16, #tpu.memory_space<vmem>>, vector<128x128xbf16>
    %cst = arith.constant dense<0.000000e+00> : vector<16x128xf32>
    %2 = tpu.matmul %0, %1, %cst {dimension_numbers = #tpu.dot_dimension_numbers<[1], [1], [0], [0], [0, 0, 1, 0], [], []>} : vector<16x128xbf16>, vector<128x128xbf16>, vector<16x128xf32> -> vector<16x128xf32>
    %cst_3 = arith.constant dense<0.000000e+00> : vector<128xf32>
    %3 = vector.multi_reduction <add>, %2, %cst_3 [0] : vector<16x128xf32> to vector<128xf32>
    %4 = vector.shape_cast %3 : vector<128xf32> to vector<1x128xf32>
    %5 = arith.mulf %2, %2 : vector<16x128xf32>
    %cst_4 = arith.constant dense<0.000000e+00> : vector<128xf32>
    %6 = vector.multi_reduction <add>, %5, %cst_4 [0] : vector<16x128xf32> to vector<128xf32>
    %7 = vector.shape_cast %6 : vector<128xf32> to vector<1x128xf32>
    %cst_5 = arith.constant 0.0769230798 : f32
    %8 = vector.broadcast %cst_5 : f32 to vector<1x128xf32>
    %9 = arith.mulf %4, %8 : vector<1x128xf32>
    %cst_6 = arith.constant 0.0769230798 : f32
    %10 = vector.broadcast %cst_6 : f32 to vector<1x128xf32>
    %11 = arith.mulf %7, %10 : vector<1x128xf32>
    %12 = arith.mulf %9, %9 : vector<1x128xf32>
    %13 = arith.subf %11, %12 : vector<1x128xf32>
    %cst_7 = arith.constant 0.000000e+00 : f32
    %14 = vector.broadcast %cst_7 : f32 to vector<1x128xf32>
    %15 = arith.maximumf %13, %14 : vector<1x128xf32>
    %c0_8 = arith.constant 0 : index
    %c0_9 = arith.constant 0 : index
    %16 = vector.load %arg5[%c0_8, %c0_9] : memref<8x128xf32, #tpu.memory_space<vmem>>, vector<1x128xf32>
    %cst_10 = arith.constant 9.99999974E-6 : f32
    %17 = vector.broadcast %cst_10 : f32 to vector<1x128xf32>
    %18 = arith.addf %15, %17 : vector<1x128xf32>
    %19 = math.rsqrt %18 : vector<1x128xf32>
    %20 = arith.mulf %16, %19 : vector<1x128xf32>
    %c1 = arith.constant 1 : index
    %c0_11 = arith.constant 0 : index
    %21 = vector.load %arg5[%c1, %c0_11] : memref<8x128xf32, #tpu.memory_space<vmem>>, vector<1x128xf32>
    %22 = arith.mulf %9, %20 : vector<1x128xf32>
    %23 = arith.subf %21, %22 : vector<1x128xf32>
    %24 = vector.broadcast %20 : vector<1x128xf32> to vector<16x128xf32>
    %25 = arith.mulf %2, %24 : vector<16x128xf32>
    %26 = vector.broadcast %23 : vector<1x128xf32> to vector<16x128xf32>
    %27 = arith.addf %25, %26 : vector<16x128xf32>
    %cst_12 = arith.constant 0.000000e+00 : f32
    %28 = vector.broadcast %cst_12 : f32 to vector<16x128xf32>
    %29 = arith.maximumf %27, %28 : vector<16x128xf32>
    %30 = tpu.iota {dimensions = array<i32: 0>} : vector<16x1xi32>
    %c13_i32 = arith.constant 13 : i32
    %31 = vector.broadcast %c13_i32 : i32 to vector<16x1xi32>
    %32 = arith.cmpi slt, %30, %31 : vector<16x1xi32>
    %cst_13 = arith.constant 0.000000e+00 : f32
    %33 = vector.shape_cast %32 : vector<16x1xi1> to vector<16x1xi1>
    %34 = vector.broadcast %33 : vector<16x1xi1> to vector<16x128xi1>
    %35 = vector.broadcast %cst_13 : f32 to vector<16x128xf32>
    %36 = arith.select %34, %29, %35 : vector<16x128xi1>, vector<16x128xf32>
    %37 = arith.truncf %36 : vector<16x128xf32> to vector<16x128xbf16>
    %c0_14 = arith.constant 0 : index
    %c0_15 = arith.constant 0 : index
    %38 = vector.load %arg4[%c0_14, %c0_15] : memref<128x128xbf16, #tpu.memory_space<vmem>>, vector<128x128xbf16>
    %cst_16 = arith.constant dense<0.000000e+00> : vector<16x128xf32>
    %39 = tpu.matmul %37, %38, %cst_16 {dimension_numbers = #tpu.dot_dimension_numbers<[1], [1], [0], [0], [0, 0, 1, 0], [], []>} : vector<16x128xbf16>, vector<128x128xbf16>, vector<16x128xf32> -> vector<16x128xf32>
    %cst_17 = arith.constant dense<0.000000e+00> : vector<128xf32>
    %40 = vector.multi_reduction <add>, %39, %cst_17 [0] : vector<16x128xf32> to vector<128xf32>
    %41 = vector.shape_cast %40 : vector<128xf32> to vector<1x128xf32>
    %42 = arith.mulf %39, %39 : vector<16x128xf32>
    %cst_18 = arith.constant dense<0.000000e+00> : vector<128xf32>
    %43 = vector.multi_reduction <add>, %42, %cst_18 [0] : vector<16x128xf32> to vector<128xf32>
    %44 = vector.shape_cast %43 : vector<128xf32> to vector<1x128xf32>
    %cst_19 = arith.constant 0.0769230798 : f32
    %45 = vector.broadcast %cst_19 : f32 to vector<1x128xf32>
    %46 = arith.mulf %41, %45 : vector<1x128xf32>
    %cst_20 = arith.constant 0.0769230798 : f32
    %47 = vector.broadcast %cst_20 : f32 to vector<1x128xf32>
    %48 = arith.mulf %44, %47 : vector<1x128xf32>
    %49 = arith.mulf %46, %46 : vector<1x128xf32>
    %50 = arith.subf %48, %49 : vector<1x128xf32>
    %cst_21 = arith.constant 0.000000e+00 : f32
    %51 = vector.broadcast %cst_21 : f32 to vector<1x128xf32>
    %52 = arith.maximumf %50, %51 : vector<1x128xf32>
    %c0_22 = arith.constant 0 : index
    %c0_23 = arith.constant 0 : index
    %53 = vector.load %arg6[%c0_22, %c0_23] : memref<8x128xf32, #tpu.memory_space<vmem>>, vector<1x128xf32>
    %cst_24 = arith.constant 9.99999974E-6 : f32
    %54 = vector.broadcast %cst_24 : f32 to vector<1x128xf32>
    %55 = arith.addf %52, %54 : vector<1x128xf32>
    %56 = math.rsqrt %55 : vector<1x128xf32>
    %57 = arith.mulf %53, %56 : vector<1x128xf32>
    %c1_25 = arith.constant 1 : index
    %c0_26 = arith.constant 0 : index
    %58 = vector.load %arg6[%c1_25, %c0_26] : memref<8x128xf32, #tpu.memory_space<vmem>>, vector<1x128xf32>
    %59 = arith.mulf %46, %57 : vector<1x128xf32>
    %60 = arith.subf %58, %59 : vector<1x128xf32>
    %61 = vector.broadcast %57 : vector<1x128xf32> to vector<16x128xf32>
    %62 = arith.mulf %39, %61 : vector<16x128xf32>
    %63 = vector.broadcast %60 : vector<1x128xf32> to vector<16x128xf32>
    %64 = arith.addf %62, %63 : vector<16x128xf32>
    %c0_27 = arith.constant 0 : index
    %c0_28 = arith.constant 0 : index
    %65 = vector.load %arg2[%c0_27, %c0_28] : memref<16x128xf32, #tpu.memory_space<vmem>>, vector<16x128xf32>
    %66 = arith.addf %64, %65 : vector<16x128xf32>
    %cst_29 = arith.constant 0.000000e+00 : f32
    %67 = vector.broadcast %cst_29 : f32 to vector<16x128xf32>
    %68 = arith.maximumf %66, %67 : vector<16x128xf32>
    %c0_30 = arith.constant 0 : index
    %c0_31 = arith.constant 0 : index
    %69 = vector.load %arg7[%c0_30, %c0_31] : memref<16x128xf32, #tpu.memory_space<vmem>>, vector<16x128xf32>
    tpu.vector_store %arg7[%c0_30, %c0_31], %68 {strides = array<i32>} : memref<16x128xf32, #tpu.memory_space<vmem>>, vector<16x128xf32>,
    return
  }
  func.func @transform_0(%arg0: i32) -> (i32, i32) {
    %c0_i32 = arith.constant 0 : i32
    %c0_i32_0 = arith.constant 0 : i32
    %c0_i32_1 = arith.constant 0 : i32
    return %c0_i32, %c0_i32_0 : i32, i32
  }
  func.func @transform_1(%arg0: i32) -> (i32, i32) {
    %c0_i32 = arith.constant 0 : i32
    %c0_i32_0 = arith.constant 0 : i32
    %c0_i32_1 = arith.constant 0 : i32
    return %c0_i32, %c0_i32_0 : i32, i32
  }
  func.func @transform_2(%arg0: i32) -> (i32, i32) {
    %c0_i32 = arith.constant 0 : i32
    %c0_i32_0 = arith.constant 0 : i32
    %c0_i32_1 = arith.constant 0 : i32
    return %c0_i32, %c0_i32_0 : i32, i32
  }
  func.func @transform_3(%arg0: i32) -> (i32, i32) {
    %c0_i32 = arith.constant 0 : i32
    %c0_i32_0 = arith.constant 0 : i32
    %c0_i32_1 = arith.constant 0 : i32
    return %c0_i32, %c0_i32_0 : i32, i32
  }
  func.func @transform_4(%arg0: i32) -> (i32, i32) {
    %c0_i32 = arith.constant 0 : i32
    %c0_i32_0 = arith.constant 0 : i32
    %c0_i32_1 = arith.constant 0 : i32
    return %c0_i32, %c0_i32_0 : i32, i32
  }
  func.func @transform_5(%arg0: i32) -> (i32, i32) {
    %c0_i32 = arith.constant 0 : i32
    %c0_i32_0 = arith.constant 0 : i32
    %c0_i32_1 = arith.constant 0 : i32
    return %c0_i32, %c0_i32_0 : i32, i32
  }
  func.func @transform_6(%arg0: i32) -> (i32, i32) {
    %c0_i32 = arith.constant 0 : i32
    %c0_i32_0 = arith.constant 0 : i32
    %c0_i32_1 = arith.constant 0 : i32
    return %c0_i32, %c0_i32_0 : i32, i32
  }
}

</mosaic_0001>

<bundles_post_ra>
// kernel: resblock_forward.1
= control target key start
LH: loop header
LB: loop body
LE: loop exit
PB: predicated region body
PF: predicated region fallthrough
CT: control target
= control target key end

     0   :  { %11 = vsyncpa [#allocation3], 0  ;;  %s599_s0 = inlined_call_operand.vmem [shape: bf16[16,128], index: 0, kind: input, shape index: {}]   ;;  %s600_s1 = inlined_call_operand.vmem [shape: f32[16,128], index: 1, kind: input, shape index: {}]   ;;  %s601_s2 = inlined_call_operand.hbm [shape: bf16[128,128], index: 2, kind: input, shape index: {}]   ;;  %s602_s3 = inlined_call_operand.hbm [shape: bf16[128,128], index: 3, kind: input, shape index: {}]   ;;  %s603_s4 = inlined_call_operand.vmem [shape: f32[8,128], index: 4, kind: input, shape index: {}]   ;;  %s604_s5 = inlined_call_operand.vmem [shape: f32[8,128], index: 5, kind: input, shape index: {}]   ;;  %s605_s6 = inlined_call_operand.hbm [shape: f32[16,128], index: 6, kind: output, shape index: {}]  }
   0x1   :  { %12 = vsyncpa [#allocation6], 0 }
   0x2   :  { %13 = vsyncpa [#allocation4], 0  ;;  %s22_s23 = sshll.u32 %s601_s2, 4  ;;  %s526_s24 = smov [#allocation2]   ;;  %s23_s23 = int_to_ptr.hbm [resolvable:$true] %s22_s23 }
   0x3   :  { %s24_s25 = sshll.u32 %s526_s24, 4  ;;  %s35_s28 = sshll.u32 %s602_s3, 4  ;;  %s25_s25 = int_to_ptr.vmem [resolvable:$true] %s24_s25  ;;  %s36_s28 = int_to_ptr.hbm [resolvable:$true] %s35_s28 }
   0x4   :  { %s527_s29 = smov 64   ;;  %s528_s30 = smov 4  }
   0x5   :  { %30 = dma.hbm_to_vmem [thread:$0]  %s23_s23, 1024, %s25_s25, [#allocation3], %s527_s29, %s527_s29, %s528_s30  }
   0x6   :  { %s529_s7 = smov [#allocation5]  }
   0x7   :  { %s37_s8 = sshll.u32 %s529_s7, 4  ;;  %s38_s8 = int_to_ptr.vmem [resolvable:$true] %s37_s8 }
   0x8   :  { %43 = dma.hbm_to_vmem [thread:$0]  %s36_s28, 1024, %s38_s8, [#allocation6], %s527_s29, %s527_s29, %s528_s30  }
   0x9   :  { %520 = dma.done.wait [#allocation3], 1024  }
   0xa   :  { %521 = vsyncadd [#allocation3], 4294966272 }
   0xb   :  { %522 = dma.done.wait [#allocation6], 1024  }
   0xc   :  { %523 = vsyncadd [#allocation6], 4294966272  ;;  %v427_v0 = vld [vmem:[#allocation2 + $0x38] sm:$0xff]  ;;  %v426_v1 = vld [vmem:[#allocation2 + $0x30] sm:$0xff]  ;;  %v187_v46 = vlaneseq  ;;  %vm530_vm4 = vmmov 1   ;;  %s531_s19 = smov [#allocation7]  }
   0xd   :  { %128 = vmatpush.bf16.xpose.msra.mxu0 %v427_v0  ;;  %v425_v2 = vld [vmem:[#allocation2 + $0x28] sm:$0xff]  ;;  %v424_v3 = vld [vmem:[#allocation2 + $0x20] sm:$0xff]  ;;  %v423_v4 = vld [vmem:[#allocation2 + $0x18] sm:$0xff]  ;;  %s332_s20 = sshll.u32 %s531_s19, 4  ;;  %s334_s22 = sshll.u32 %s605_s6, 4  ;;  %s333_s20 = int_to_ptr.vmem [resolvable:$true] %s332_s20  ;;  %s335_s22 = int_to_ptr.hbm [resolvable:$true] %s334_s22 }
   0xe   :  { %v422_v5 = vld [vmem:[#allocation2 + $0x10] sm:$0xff]  ;;  %v421_v6 = vld [vmem:[#allocation2 + $0x8] sm:$0xff]  ;;  %v420_v7 = vld [vmem:[#allocation2] sm:$0xff]  ;;  %v188_v51 = vshrl.u32 %v187_v46, 7  ;;  %s532_s23 = smov 128   ;;  %s533_s24 = smov 8  }
   0xf   :  { %v419_v8 = vld [vmem:[%s599_s0] sm:$0xff]  ;;  %v435_v9 = vld [vmem:[#allocation5 + $0x38] sm:$0xff]  ;;  %v434_v10 = vld [vmem:[#allocation5 + $0x30] sm:$0xff] }
  0x10   :  { %263 = vmatpush.bf16.xpose.msra.mxu1 %v435_v9  ;;  %v433_v11 = vld [vmem:[#allocation5 + $0x28] sm:$0xff]  ;;  %v432_v12 = vld [vmem:[#allocation5 + $0x20] sm:$0xff]  ;;  %v431_v14 = vld [vmem:[#allocation5 + $0x18] sm:$0xff]  ;;  %v189_v56 = vadd.s32 8, %v188_v51 }
  0x11   :  { %v430_v16 = vld [vmem:[#allocation5 + $0x10] sm:$0xff]  ;;  %v429_v26 = vld [vmem:[#allocation5 + $0x8] sm:$0xff]  ;;  %v428_v35 = vld [vmem:[#allocation5] sm:$0xff] }
  0x12   :  { %v163_v47 = vld [vmem:[%s603_s4] sm:$0x1]  ;;  %v176_v52 = vld [vmem:[%s603_s4 + $0x1] sm:$0x1]  ;;  %vm191_vm3 = vcmp.lt.s32.totalorder %v189_v56, 13 }
  0x13   :  { %vm416_vm5 = vmpackc.low %vm191_vm3, %vm530_vm4 }
  0x15   :  { %129 = vmatpush.bf16.xpose.msra.mxu0 %v426_v1 }
  0x18   :  { %264 = vmatpush.bf16.xpose.msra.mxu1 %v434_v10 }
  0x1d   :  { %130 = vmatpush.bf16.xpose.msra.mxu0 %v425_v2 }
  0x20   :  { %265 = vmatpush.bf16.xpose.msra.mxu1 %v433_v11 }
  0x25   :  { %131 = vmatpush.bf16.xpose.msra.mxu0 %v424_v3 }
  0x28   :  { %266 = vmatpush.bf16.xpose.msra.mxu1 %v432_v12 }
  0x2d   :  { %132 = vmatpush.bf16.xpose.msra.mxu0 %v423_v4 }
  0x30   :  { %267 = vmatpush.bf16.xpose.msra.mxu1 %v431_v14 }
  0x35   :  { %133 = vmatpush.bf16.xpose.msra.mxu0 %v422_v5 }
  0x38   :  { %268 = vmatpush.bf16.xpose.msra.mxu1 %v430_v16 }
  0x3d   :  { %134 = vmatpush.bf16.xpose.msra.mxu0 %v421_v6 }
  0x40   :  { %269 = vmatpush.bf16.xpose.msra.mxu1 %v429_v26 }
  0x45   :  { %135 = vmatpush.bf16.xpose.msra.mxu0 %v420_v7 }
  0x48   :  { %270 = vmatpush.bf16.xpose.msra.mxu1 %v428_v35 }
  0x4c   :  { %136 = vmatmul.bf16.vlgmr.msra.gmra.mxu0 %v419_v8 }
  0xc9   :  { %v137_v13 = vpop.f32.mrf.mxu0 }
  0xca   :  { %v149_v17 = vmul.f32 %v137_v13, %v137_v13 }
  0xd1   :  { %v139_v15 = vpop.f32.mrf.mxu0 }
  0xd2   :  { %v142_v18 = vadd.f32 %v139_v15, %v137_v13  ;;  %v150_v19 = vmul.f32 %v139_v15, %v139_v15 }
  0xd4   :  { %v143_v20 = vrot.slane %v142_v18, 4  ;;  %v151_v21 = vadd.f32 %v150_v19, %v149_v17 }
  0xd6   :  { %v144_v22 = vadd.f32 %v143_v20, %v142_v18  ;;  %v152_v23 = vrot.slane %v151_v21, 4 }
  0xd8   :  { %v145_v24 = vrot.slane %v144_v22, 2  ;;  %v153_v25 = vadd.f32 %v152_v23, %v151_v21 }
  0xda   :  { %v146_v27 = vadd.f32 %v145_v24, %v144_v22  ;;  %v154_v28 = vrot.slane %v153_v25, 2 }
  0xdc   :  { %v147_v29 = vrot.slane %v146_v27, 1  ;;  %v155_v30 = vadd.f32 %v154_v28, %v153_v25 }
  0xde   :  { %v148_v31 = vadd.f32 %v147_v29, %v146_v27  ;;  %v156_v32 = vrot.slane %v155_v30, 1 }
  0xe0   :  { %v157_v33 = vadd.f32 %v156_v32, %v155_v30  ;;  %v158_v34 = vmul.f32 0.07692308, %v148_v31  ;;  %v298_v30 = vld [vmem:[%s604_s5] sm:$0x1] }
  0xe2   :  { %v159_v36 = vmul.f32 0.07692308, %v157_v33  ;;  %v160_v37 = vmul.f32 %v158_v34, %v158_v34 }
  0xe4   :  { %v161_v38 = vsub.f32 %v159_v36, %v160_v37 }
  0xe6   :  { %v162_v39 = vmax.f32 %v161_v38, 0.0 }
  0xe8   :  { %v164_v40 = vadd.f32 1e-05, %v162_v39 }
  0xea   :  { %444 = vrsqrt.f32 %v164_v40  ;;  %vm171_vm1 = vweird.f32 %v164_v40 }
  0xf0   :  { %v445_v41 = vpop.eup %444 }
  0xf1   :  { %v166_v42 = vmul.f32 %v445_v41, %v164_v40  ;;  %vm172_vm0 = vweird.f32 %v445_v41 }
  0xf2   :  { %vm173_vm2 = vmor %vm171_vm1, %vm172_vm0 }
  0xf3   :  { %v167_v43 = vmul.f32 %v445_v41, %v166_v42  ;;  %v321_v42 = vld [vmem:[%s600_s1 + $0x8] sm:$0xff] }
  0xf5   :  { %v168_v44 = vmul.f32 0.5, %v167_v43 }
  0xf7   :  { %v169_v45 = vsub.f32 1.5, %v168_v44 }
  0xf9   :  { %v170_v48 = vmul.f32 %v445_v41, %v169_v45 }
  0xfb   :  { %v174_v49 = vsel %vm173_vm2, %v445_v41, %v170_v48  ;;  %v320_v41 = vld [vmem:[%s600_s1] sm:$0xff] }
  0xfc   :  { %v175_v50 = vmul.f32 %v174_v49, %v163_v47 }
  0xfe   :  { %v177_v53 = vmul.f32 %v175_v50, %v158_v34  ;;  %v179_v54 = vperm.slane %v175_v50, 0  ;;  %v311_v34 = vld [vmem:[%s604_s5 + $0x1] sm:$0x1] }
 0x100   :  { %v178_v55 = vsub.f32 %v176_v52, %v177_v53  ;;  %v180_v57 = vmul.f32 %v179_v54, %v137_v13  ;;  %v181_v58 = vmul.f32 %v179_v54, %v139_v15 }
 0x102   :  { %v182_v59 = vperm.slane %v178_v55, 0 }
 0x104   :  { %v184_v60 = vadd.f32 %v182_v59, %v181_v58  ;;  %v183_v61 = vadd.f32 %v182_v59, %v180_v57 }
 0x106   :  { %v186_v62 = vmax.f32 %v184_v60, 0.0  ;;  %v185_v63 = vmax.f32 %v183_v61, 0.0 }
 0x108   :  { %v417_v0 = vpack.c.bf16 %v186_v62, %v185_v63 }
 0x10a   :  { %418 = vmatmul.msk.bf16.vlgmr.msra.gmra.mxu1 %vm416_vm5, %v417_v0 }
 0x187   :  { %v272_v1 = vpop.f32.mrf.mxu1 }
 0x188   :  { %v284_v3 = vmul.f32 %v272_v1, %v272_v1 }
 0x18f   :  { %v274_v2 = vpop.f32.mrf.mxu1 }
 0x190   :  { %v277_v4 = vadd.f32 %v274_v2, %v272_v1  ;;  %v285_v5 = vmul.f32 %v274_v2, %v274_v2 }
 0x192   :  { %v278_v6 = vrot.slane %v277_v4, 4  ;;  %v286_v7 = vadd.f32 %v285_v5, %v284_v3 }
 0x194   :  { %v279_v8 = vadd.f32 %v278_v6, %v277_v4  ;;  %v287_v9 = vrot.slane %v286_v7, 4 }
 0x196   :  { %v280_v10 = vrot.slane %v279_v8, 2  ;;  %v288_v11 = vadd.f32 %v287_v9, %v286_v7 }
 0x198   :  { %v281_v12 = vadd.f32 %v280_v10, %v279_v8  ;;  %v289_v13 = vrot.slane %v288_v11, 2 }
 0x19a   :  { %v282_v14 = vrot.slane %v281_v12, 1  ;;  %v290_v15 = vadd.f32 %v289_v13, %v288_v11 }
 0x19c   :  { %v283_v16 = vadd.f32 %v282_v14, %v281_v12  ;;  %v291_v17 = vrot.slane %v290_v15, 1 }
 0x19e   :  { %v292_v18 = vadd.f32 %v291_v17, %v290_v15  ;;  %v293_v19 = vmul.f32 0.07692308, %v283_v16 }
 0x1a0   :  { %v294_v20 = vmul.f32 0.07692308, %v292_v18  ;;  %v295_v21 = vmul.f32 %v293_v19, %v293_v19 }
 0x1a2   :  { %v296_v22 = vsub.f32 %v294_v20, %v295_v21 }
 0x1a4   :  { %v297_v23 = vmax.f32 %v296_v22, 0.0 }
 0x1a6   :  { %v299_v24 = vadd.f32 1e-05, %v297_v23 }
 0x1a8   :  { %446 = vrsqrt.f32 %v299_v24  ;;  %vm306_vm7 = vweird.f32 %v299_v24 }
 0x1ae   :  { %v447_v25 = vpop.eup %446 }
 0x1af   :  { %v301_v26 = vmul.f32 %v447_v25, %v299_v24  ;;  %vm307_vm6 = vweird.f32 %v447_v25 }
 0x1b0   :  { %vm308_vm8 = vmor %vm306_vm7, %vm307_vm6 }
 0x1b1   :  { %v302_v27 = vmul.f32 %v447_v25, %v301_v26 }
 0x1b3   :  { %v303_v28 = vmul.f32 0.5, %v302_v27 }
 0x1b5   :  { %v304_v29 = vsub.f32 1.5, %v303_v28 }
 0x1b7   :  { %v305_v31 = vmul.f32 %v447_v25, %v304_v29 }
 0x1b9   :  { %v309_v32 = vsel %vm308_vm8, %v447_v25, %v305_v31 }
 0x1ba   :  { %v310_v33 = vmul.f32 %v309_v32, %v298_v30 }
 0x1bc   :  { %v312_v35 = vmul.f32 %v310_v33, %v293_v19  ;;  %v314_v36 = vperm.slane %v310_v33, 0 }
 0x1be   :  { %v313_v37 = vsub.f32 %v311_v34, %v312_v35  ;;  %v315_v38 = vmul.f32 %v314_v36, %v272_v1  ;;  %v316_v39 = vmul.f32 %v314_v36, %v274_v2 }
 0x1c0   :  { %v317_v40 = vperm.slane %v313_v37, 0 }
 0x1c2   :  { %v318_v43 = vadd.f32 %v317_v40, %v315_v38  ;;  %v319_v44 = vadd.f32 %v317_v40, %v316_v39 }
 0x1c4   :  { %v322_v45 = vadd.f32 %v320_v41, %v318_v43  ;;  %v323_v46 = vadd.f32 %v321_v42, %v319_v44 }
 0x1c6   :  { %v324_v47 = vmax.f32 %v322_v45, 0.0  ;;  %v325_v48 = vmax.f32 %v323_v46, 0.0 }
 0x1c8   :  { %327 = vst [vmem:[#allocation7 + $0x8] sm:$0xff] %v325_v48 }
 0x1c9   :  { %326 = vst [vmem:[#allocation7] sm:$0xff] %v324_v47 }
 0x1ca   :  { %340 = dma.vmem_to_hbm [thread:$0]  %s333_s20, 256, %s335_s22, [#allocation4], %s532_s23, %s532_s23, %s533_s24  }
 0x1cb   :  { %524 = dma.done.wait [#allocation4], 256  }
 0x1cc   :  { %525 = vsyncadd [#allocation4], 4294967040 }
 0x1cd   :  { %345 = vsyncpa [#allocation3], 1 }
 0x1ce   :  { %346 = vsyncpa [#allocation6], 1 }
 0x1cf   :  { %347 = vsyncpa [#allocation4], 1 }

</bundles_post_ra>
